<compile_context>
chip_gen: v7x
topology: tpu7x:2x2x1
jax: 0.10.0
libtpu: 0.0.40
codegen_flags: <defaults>
</compile_context>

<pallas_src>
import jax
import jax.numpy as jnp
from jax.experimental import pallas as pl
from jax.experimental.pallas import tpu as pltpu

LANE = 128  # TPU lane width; spatial tile sizes are multiples of this.


# -----------------------------------------------------------------------------
# Pallas kernel: one (batch, spatial-tile) block, all M heads at once
# -----------------------------------------------------------------------------
def _side_heads_kernel(x_ref, w_ref, b_ref, o_ref):
    # x_ref: (1, ic, tile_hw) f32   activations (pixels on lanes, channels on sublanes)
    # w_ref: (Co, ic)         f32   fused per-head 1x1-conv weights (resident)
    # b_ref: (Co, 1)          f32   fused biases (resident)
    # o_ref: (1, Co, tile_hw) f32   fused per-head outputs
    x = x_ref[0]                                   # (ic, tile_hw)
    y = jnp.dot(w_ref[...], x, preferred_element_type=jnp.float32)  # (Co, tile_hw)
    o_ref[0] = y + b_ref[...]


def fused_side_heads(x3d, w_all, b_all, *, tile_hw):
    """x3d: (N, ic, HWp) f32, w_all: (Co, ic) f32, b_all: (Co, 1) f32 -> (N, Co, HWp) f32."""
    N, ic, HWp = x3d.shape
    Co = w_all.shape[0]
    assert HWp % tile_hw == 0 and tile_hw % LANE == 0

    cost = pl.CostEstimate(
        flops=2 * N * Co * ic * HWp,
        transcendentals=0,
        bytes_accessed=(N * ic * HWp + N * Co * HWp + Co * ic + Co) * 4,
    )

    return pl.pallas_call(
        _side_heads_kernel,
        out_shape=jax.ShapeDtypeStruct((N, Co, HWp), jnp.float32),
        grid=(N, HWp // tile_hw),
        in_specs=[
            pl.BlockSpec((1, ic, tile_hw), lambda n, j: (n, 0, j)),  # activation tile
            pl.BlockSpec((Co, ic), lambda n, j: (0, 0)),             # fused weights (resident)
            pl.BlockSpec((Co, 1), lambda n, j: (0, 0)),              # fused bias (resident)
        ],
        out_specs=pl.BlockSpec((1, Co, tile_hw), lambda n, j: (n, 0, j)),
        compiler_params=pltpu.CompilerParams(
            dimension_semantics=("parallel", "parallel"),            # megacore-shardable
            vmem_limit_bytes=32 * 1024 * 1024,
        ),
        cost_estimate=cost,
    )(x3d, w_all, b_all)


# -----------------------------------------------------------------------------
# Wrapper: NCHW in, list of M NCHW maps out (matches the PyTorch module)
# -----------------------------------------------------------------------------
def _round_up(v, m):
    return (v + m - 1) // m * m


def side_classifier_forward(x_nchw, params, *, tile_hw=1024):
    """x_nchw: (N, ic, H, W) f32 -> [ (N, n_class, H, W) f32 ] * M."""
    N, ic, H, W = x_nchw.shape
    M = len(params["w"])
    n_class = params["w"][0].shape[0]
    Co = M * n_class

    # Channel-major: NCHW already has channels on sublanes / pixels on lanes.
    HW = H * W
    x3d = x_nchw.reshape(N, ic, HW)

    # Pick the lane tile (multiple of 128, capped to padded HW) and pad HW only
    # when needed so the spatial grid axis divides evenly.
    HWp = _round_up(HW, LANE)
    tile = min(_round_up(tile_hw, LANE), HWp)
    HWp = _round_up(HWp, tile)
    if HWp != HW:
        x3d = jnp.pad(x3d, ((0, 0), (0, 0), (0, HWp - HW)))

    # Fuse the M 1x1-conv heads: (Co, ic) weight matrix and (Co, 1) bias.
    w_all = jnp.concatenate([w.reshape(n_class, ic) for w in params["w"]], axis=0)
    b_all = jnp.concatenate(list(params["b"]), axis=0).reshape(Co, 1)

    y = fused_side_heads(x3d, w_all, b_all, tile_hw=tile)     # (N, Co, HWp) f32
    y = y[:, :, :HW].reshape(N, Co, H, W)                     # already NCHW, no transpose
    return [y[:, m * n_class:(m + 1) * n_class] for m in range(M)]


# -----------------------------------------------------------------------------
# Pure-JAX reference (f32) and parameter init
# -----------------------------------------------------------------------------
def side_classifier_ref(x_nchw, params):
    outs = []
    for w, b in zip(params["w"], params["b"]):
        y = jnp.einsum("nchw,oc->nohw", x_nchw, w.reshape(w.shape[0], w.shape[1]))
        outs.append(y + b[None, :, None, None])
    return outs


def init_params(key, ic, n_class=1, M=2):
    """Mimics PyTorch Conv2d default init (uniform +/- 1/sqrt(fan_in), k=1)."""
    keys = jax.random.split(key, 2 * M)
    bound = 1.0 / (ic ** 0.5)
    ws, bs = [], []
    for m in range(M):
        ws.append(jax.random.uniform(keys[2 * m], (n_class, ic, 1, 1),
                                     minval=-bound, maxval=bound, dtype=jnp.float32))
        bs.append(jax.random.uniform(keys[2 * m + 1], (n_class,),
                                     minval=-bound, maxval=bound, dtype=jnp.float32))
    return {"w": ws, "b": bs}


# -----------------------------------------------------------------------------
if __name__ == "__main__":
    key = jax.random.PRNGKey(0)
    kp, kx = jax.random.split(key)

    N, ic, H, W = 2, 16, 16, 16      # SideClassifer(ic=16, n_class=1, M=2, kernel_size=1)
    n_class, M = 1, 2
    params = init_params(kp, ic, n_class=n_class, M=M)
    x = jax.random.normal(kx, (N, ic, H, W), dtype=jnp.float32)

    outs = side_classifier_forward(x, params)
    outs = jax.block_until_ready(outs)
    refs = side_classifier_ref(x, params)

    assert len(outs) == M
    for o, r in zip(outs, refs):
        assert o.shape == (N, n_class, H, W), o.shape
        assert bool(jnp.all(jnp.isfinite(o)))
        assert bool(jnp.allclose(o, r, rtol=2e-2, atol=2e-2)), \
            float(jnp.max(jnp.abs(o - r)))

    print("KERNEL_OK")
</pallas_src>

<mosaic_0001>
module attributes {stable_mosaic.version = 11 : i64} {
  func.func @_side_heads_kernel(%arg0: i32, %arg1: i32, %arg2: memref<1x16x256xf32, #tpu.memory_space<vmem>>, %arg3: memref<2x16xf32, #tpu.memory_space<vmem>>, %arg4: memref<2x1xf32, #tpu.memory_space<vmem>>, %arg5: memref<1x2x256xf32, #tpu.memory_space<vmem>>) attributes {dimension_semantics = [#tpu.dimension_semantics<parallel>, #tpu.dimension_semantics<parallel>], iteration_bounds = array<i64: 2, 1>, scalar_prefetch = 0 : i64, scratch_operands = 0 : i64, tpu.core_type = #tpu.core_type<tc>, window_params = [{transform_indices = @transform_0, window_bounds = array<i64: 1, 16, 256>}, {pipeline_mode = #tpu.pipeline_mode<synchronous>, transform_indices = @transform_1, window_bounds = array<i64: 2, 16>}, {pipeline_mode = #tpu.pipeline_mode<synchronous>, transform_indices = @transform_2, window_bounds = array<i64: 2, 1>}, {transform_indices = @transform_3, window_bounds = array<i64: 1, 2, 256>}]} {
    %c0 = arith.constant 0 : index
    %c0_0 = arith.constant 0 : index
    %c0_1 = arith.constant 0 : index
    %0 = vector.load %arg2[%c0, %c0_0, %c0_1] : memref<1x16x256xf32, #tpu.memory_space<vmem>>, vector<1x16x256xf32>
    %1 = vector.shape_cast %0 : vector<1x16x256xf32> to vector<16x256xf32>
    %c0_2 = arith.constant 0 : index
    %c0_3 = arith.constant 0 : index
    %2 = vector.load %arg3[%c0_2, %c0_3] : memref<2x16xf32, #tpu.memory_space<vmem>>, vector<2x16xf32>
    %cst = arith.constant dense<0.000000e+00> : vector<2x256xf32>
    %3 = tpu.matmul %2, %1, %cst {dimension_numbers = #tpu.dot_dimension_numbers<[1], [0], [0], [1], [0, 0, 1, 1], [], []>} : vector<2x16xf32>, vector<16x256xf32>, vector<2x256xf32> -> vector<2x256xf32>
    %c0_4 = arith.constant 0 : index
    %c0_5 = arith.constant 0 : index
    %4 = vector.load %arg4[%c0_4, %c0_5] : memref<2x1xf32, #tpu.memory_space<vmem>>, vector<2x1xf32>
    %5 = vector.broadcast %4 : vector<2x1xf32> to vector<2x256xf32>
    %6 = arith.addf %3, %5 : vector<2x256xf32>
    %c0_6 = arith.constant 0 : index
    %c0_7 = arith.constant 0 : index
    %c0_8 = arith.constant 0 : index
    %7 = vector.load %arg5[%c0_6, %c0_7, %c0_8] : memref<1x2x256xf32, #tpu.memory_space<vmem>>, vector<1x2x256xf32>
    %8 = vector.shape_cast %7 : vector<1x2x256xf32> to vector<2x256xf32>
    %9 = vector.shape_cast %6 : vector<2x256xf32> to vector<1x2x256xf32>
    tpu.vector_store %arg5[%c0_6, %c0_7, %c0_8], %9 {strides = array<i32>} : memref<1x2x256xf32, #tpu.memory_space<vmem>>, vector<1x2x256xf32>,
    return
  }
  func.func @transform_0(%arg0: i32, %arg1: i32) -> (i32, i32, i32) {
    %c0_i32 = arith.constant 0 : i32
    %c0_i32_0 = arith.constant 0 : i32
    return %arg0, %c0_i32, %arg1 : i32, i32, i32
  }
  func.func @transform_1(%arg0: i32, %arg1: i32) -> (i32, i32) {
    %c0_i32 = arith.constant 0 : i32
    %c0_i32_0 = arith.constant 0 : i32
    %c0_i32_1 = arith.constant 0 : i32
    return %c0_i32, %c0_i32_0 : i32, i32
  }
  func.func @transform_2(%arg0: i32, %arg1: i32) -> (i32, i32) {
    %c0_i32 = arith.constant 0 : i32
    %c0_i32_0 = arith.constant 0 : i32
    %c0_i32_1 = arith.constant 0 : i32
    return %c0_i32, %c0_i32_0 : i32, i32
  }
  func.func @transform_3(%arg0: i32, %arg1: i32) -> (i32, i32, i32) {
    %c0_i32 = arith.constant 0 : i32
    %c0_i32_0 = arith.constant 0 : i32
    return %arg0, %c0_i32, %arg1 : i32, i32, i32
  }
}

</mosaic_0001>

<bundles_post_ra>
// kernel: tpu_custom_call.1
= control target key start
LH: loop header
LB: loop body
LE: loop exit
PB: predicated region body
PF: predicated region fallthrough
CT: control target
= control target key end

     0   :  { %8 = vsyncpa [#allocation3], 0  ;;  %s818_s0 = inlined_call_operand.hbm [shape: f32[2,16,256], index: 0, kind: input, shape index: {}]   ;;  %s819_s1 = inlined_call_operand.vmem [shape: f32[2,16], index: 1, kind: input, shape index: {}]   ;;  %s820_s2 = inlined_call_operand.vmem [shape: f32[2,1], index: 2, kind: input, shape index: {}]   ;;  %s821_s3 = inlined_call_operand.hbm [shape: f32[2,2,256], index: 3, kind: output, shape index: {}]  }
   0x1   :  { %10 = vsyncpa [#allocation3 + $0x1], 0 }
   0x2   :  { %11 = vsyncpa [#allocation4], 0 }
   0x3   :  { %13 = vsyncpa [#allocation4 + $0x1], 0  ;;  %s638_s12 = smov 0   ;;  %s640_s13 = smov 0  }
   0x4   :  { %s642_s14 = smov 0   ;;  %s644_s15 = smov 0  }
   0x5   :  { %s646_s16 = smov 0   ;;  %s648_s17 = smov 0  }
   0x6 LB: > { %s408_s18 = sadd.s32 4294967295, %s610_s17   ;;  %s409_s19 = sadd.s32 4294967294, %s610_s17   ;;  %s610_s17 = sphi %s648_s17, %s19_s17   ;;  %s606_s16 = sphi %s646_s16, %s836_s16   ;;  %s602_s15 = sphi %s644_s15, %s835_s15   ;;  %s598_s14 = sphi %s642_s14, %s834_s14   ;;  %s594_s13 = sphi %s640_s13, %s833_s13   ;;  %s590_s12 = sphi %s638_s12, %s832_s12  }
   0x7   : > { %s31_s20 = sadd.s32 1, %s606_s16  ;;  %s40_s21 = sadd.s32 1, %s598_s14 }
   0x8   : > { %p33_p0 = scmp.ge.s32.totalorder %s31_s20, 2  ;;  %p47_p1 = scmp.ne.s32.totalorder %s598_s14, %s594_s13 }
   0x9   : > { %p48_p2 = scmp.eq.s32.totalorder %s610_s17, 0  ;;  %p53_p3 = scmp.ne.s32.totalorder %s594_s13, %s590_s12 }
   0xa   : > { %s838_s20 = smov (%p33_p0, %s31_s20), 0  ;;  %p54_p5 = scmp.eq.s32.totalorder %s408_s18, 0 }
   0xb   : > { %p679_p4 = por %p48_p2, %p47_p1  ;;  %s35_s23 = ssub.s32 %s606_s16, %s838_s20 }
   0xc   : > { %p121_p6 = scmp.eq.s32.totalorder %s408_s18, 1  ;;  %p38_p7 = scmp.eq.s32.totalorder %s35_s23, 0 }
   0xd   : > { %p685_p8 = por %p54_p5, %p53_p3  ;;  %p127_p10 = scmp.eq.s32.totalorder %s409_s19, 1 }
   0xe   : > { %p689_p9 = por %p121_p6, %p47_p1  ;;  %p443_p13 = scmp.lt.s32.totalorder %s610_s17, 2 }
   0xf   : > { %s694_s26 = scalar_select %p38_p7, %s598_s14, %s40_s21  }
  0x10   : > { %s825_s25 = scalar_select %p689_p9, 1, 0 }
  0x11   : > { %p696_p11 = por %p127_p10, %p53_p3  ;;  %s153_s28 = sand.u32 1, %s598_s14  }
  0x12   : > { %s412_s29 = sshll.u32 %s153_s28, 5  ;;  %s425_s30 = sshll.u32 %s606_s16, 9 }
  0x13   : > { %s826_s27 = scalar_select %p696_p11, 1, 0 }
  0x14   : > { %s707_s6 = scalar_lea.hbm %s818_s0, %s425_s30  ;;  %s157_s7 = scalar_lea.vmem [#allocation2], %s412_s29 }
  0x15   : > { %s166_s8 = sshll.u32 %s157_s7, 4  ;;  %p713_p0 = pnand %p443_p13, %p679_p4  ;;  %s709_s8 = int_to_ptr.vmem [resolvable:$true] %s166_s8 }
  0x16   : > { %s718_s10 = scalar_lea.sflag [#allocation3], %s153_s28  ;;  %s498_s11 = scalar_lea.hbm %s707_s6, 512 }
  0x17   : > { %p499_p2 = scmp.ne.s32.totalorder %s707_s6, %s498_s11  ;;  %p500_p3 = pneg %p713_p0 }
  0x18   : > { %s503_s21 = scalar_lea.hbm %s818_s0, 1024  ;;  %p504_p4 = scmp.lt.u32.totalorder %s707_s6, %s818_s0 }
  0x19   : > { %p501_p5 = pnand %p500_p3, %p499_p2  ;;  %p505_p7 = scmp.lt.u32.totalorder %s503_s21, %s498_s11 }
  0x1a   : > { %p507_p13 = scmp.lt.u32.totalorder %s498_s11, %s707_s6 }
  0x1b   : > { %p502_p6 = pneg %p501_p5  ;;  %p506_p10 = por %p505_p7, %p504_p4 }
  0x1d   : > { %p508_p12 = por %p507_p13, %p506_p10 }
  0x1f   : > { %p509_p1 = pnand %p508_p12, %p502_p6 }
  0x21   : > { %512 = shalt.err (!%p509_p1)
}
  0x22   : > { %s513_s28 = scalar_lea.vmem %s709_s8, 512  ;;  %s612_s29 = smov [#allocation2]  }
  0x23   : > { %p514_p2 = scmp.ne.s32.totalorder %s709_s8, %s513_s28  ;;  %s518_s30 = sshll.u32 %s612_s29, 4  ;;  %s519_s30 = int_to_ptr.vmem [resolvable:$false] %s518_s30 }
  0x24   : > { %s520_s4 = scalar_lea.vmem %s519_s30, 1024  ;;  %p521_p9 = scmp.lt.s32.totalorder %s709_s8, %s519_s30 }
  0x25   : > { %p516_p5 = pnand %p514_p2, %p500_p3  ;;  %p522_p4 = scmp.lt.s32.totalorder %s520_s4, %s513_s28 }
  0x27   : > { %p517_p11 = pneg %p516_p5  ;;  %p523_p7 = por %p522_p4, %p521_p9 }
  0x29   : > { %p524_p10 = pnand %p523_p7, %p517_p11 }
  0x2b   : > { %527 = shalt.err (!%p524_p10)
}
  0x2c   : > { %s613_s5 = smov 256   ;;  %s614_s7 = smov 16  }
  0x2d   : > { %438 = dma.hbm_to_vmem [thread:$0]  (!%p713_p0), %s707_s6, 512, %s709_s8, %s718_s10, %s613_s5, %s613_s5, %s614_s7  }
  0x2e   : > { %p174_p12 = scmp.lt.s32.totalorder %s610_s17, 3  ;;  %p828_p1 = scmp.ge.s32.totalorder %s610_s17, 1 }
  0x30   : > { %p175_p3 = pnand %p828_p1, %p174_p12 }
  0x31   : > { %s750_s11 = sand.u32 (!%p175_p3), 1, %s594_s13  }
  0x32   : > { %178 = sbr.rel (%p175_p3) target bundleno = 296 (0x128), region = 32  ;;  %s416_s18 = sshll.u32 (!%p175_p3), %s750_s11, 5 }
  0x33   : > { %s181_s19 = scalar_lea.sflag (!%p175_p3), [#allocation3], %s750_s11  ;;  %s184_s21 = scalar_lea.vmem (!%p175_p3), [#allocation2], %s416_s18 }
  0x39   : > { %581 = dma.done.wait (%p685_p8), %s181_s19, 512  }
  0x3a   : > { %583 = vsyncadd (%p685_p8), %s181_s19, 4294966784  ;;  %v615_v0 = vmov 0.0   ;;  %v616_v1 = vmov 0   ;;  %v210_v2 = vld [vmem:[%s184_s21 + $0x8] sm:$0xff]  ;;  %v212_v3 = vld [vmem:[%s184_s21 + $0x18] sm:$0xff]  ;;  %vm220_vm0 = vcmask 130048  }
  0x3b   : > { %288 = vmatprep.mubr.f32.mxu0 %v615_v0  ;;  %497 = vset.pattern.permute.xlu0 %v616_v1  ;;  %v209_v4 = vld [vmem:[%s184_s21] sm:$0xff]  ;;  %v427_v5 = vpack.c.bf16 %v212_v3, %v210_v2  ;;  %v211_v6 = vld [vmem:[%s184_s21 + $0x10] sm:$0xff]  ;;  %s417_s10 = sshll.u32 %s750_s11, 2  ;;  %s426_s22 = sshll.u32 %s602_s15, 6 }
  0x3c   : > { %v214_v7 = vld [vmem:[%s820_s2] sm:$0x3]  ;;  %v429_v8 = vpack.c.bf16 %v211_v6, %v209_v4  ;;  %s206_s23 = scalar_lea.vmem [#allocation5], %s417_s10  ;;  %s769_s4 = scalar_lea.hbm %s821_s3, %s426_s22 }
  0x3d   : > { %217 = vperm.xlu0 %497, %v214_v7   ;;  %428 = vmatprep.subr.bf16.mxu0 %v427_v5  ;;  %v213_v9 = vld [vmem:[%s819_s1] sm:$0x3]  ;;  %s324_s28 = sshll.u32 %s206_s23, 4  ;;  %s308_s5 = scalar_lea.sflag [#allocation4], %s750_s11  ;;  %s771_s28 = int_to_ptr.vmem [resolvable:$true] %s324_s28 }
  0x3e   : > { %430 = vmatpush1.bf16.msra.mxu0 %v429_v8  ;;  %s528_s7 = scalar_lea.vmem %s771_s28, 64  ;;  %p829_p9 = scmp.ne.s32.totalorder %s825_s25, 0 }
  0x3f   : > { %p529_p8 = scmp.ne.s32.totalorder %s771_s28, %s528_s7  ;;  %s617_s15 = smov [#allocation5]  }
  0x40   : > { %s532_s18 = sshll.u32 %s617_s15, 4  ;;  %s533_s18 = int_to_ptr.vmem [resolvable:$false] %s532_s18 }
  0x41   : > { %418 = vmatmul.mubr.msk.f32.vlgmr.msra.gmra.mrb[0].mxu0 %vm220_vm0, %v213_v9  ;;  %p530_p11 = pnand %p529_p8, %p829_p9  ;;  %s534_s19 = scalar_lea.vmem %s533_s18, 128 }
  0x42   : > { %p535_p6 = scmp.lt.s32.totalorder %s771_s28, %s533_s18  ;;  %p536_p13 = scmp.lt.s32.totalorder %s534_s19, %s528_s7 }
  0x43   : > { %p531_p0 = pneg %p530_p11 }
  0x44   : > { %p537_p2 = por %p536_p13, %p535_p6 }
  0x46   : > { %p538_p5 = pnand %p537_p2, %p531_p0 }
  0xbc   : > { %v218_v10 = vpop.permute.xlu0 %217 }
 0x114   : > { %v290_v11 = vpop.f32.mrb[0].mxu0 }
 0x115   : > { %v291_v12 = vadd.f32 %v290_v11, %v218_v10  ;;  %v292_v13 = vpop.f32.mrb[1].mxu0 }
 0x116   : > { %v293_v14 = vadd.f32 %v292_v13, %v218_v10 }
 0x118   : > { %v297_v15 = vcombine.low %v291_v12, %v293_v14 }
 0x11a   : > { %419 = vst.sshfl [vmem:[%s206_s23] sm:$0x33 pattern:$0x76325410] %v297_v15 }
 0x11b   : > { %541 = shalt.err (!%p538_p5)
}
 0x11c   : > { %s542_s11 = scalar_lea.hbm %s769_s4, 64  ;;  %s546_s8 = scalar_lea.hbm %s821_s3, 128 }
 0x11d   : > { %p543_p4 = scmp.ne.s32.totalorder %s769_s4, %s542_s11  ;;  %p547_p12 = scmp.lt.u32.totalorder %s769_s4, %s821_s3 }
 0x11e   : > { %p548_p1 = scmp.lt.u32.totalorder %s546_s8, %s542_s11  ;;  %p550_p8 = scmp.lt.u32.totalorder %s542_s11, %s769_s4 }
 0x11f   : > { %p544_p7 = pnand %p543_p4, %p829_p9 }
 0x120   : > { %p549_p3 = por %p548_p1, %p547_p12 }
 0x121   : > { %p545_p10 = pneg %p544_p7 }
 0x122   : > { %p551_p11 = por %p550_p8, %p549_p3 }
 0x124   : > { %p552_p0 = pnand %p551_p11, %p545_p10 }
 0x126   : > { %555 = shalt.err (!%p552_p0)
}
 0x127   : > { %433 = dma.vmem_to_hbm [thread:$0]  (%p829_p9), %s771_s28, 64, %s769_s4, %s308_s5  }
 0x128 PF: > { %s336_s10 = sand.u32 1, %s590_s12   ;;  %p830_p6 = scmp.ne.s32.totalorder %s826_s27, 0 }
 0x129   : > { %p831_p13 = scmp.ge.s32.totalorder %s610_s17, 2  ;;  %s337_s22 = scalar_lea.sflag [#allocation4], %s336_s10 }
 0x12b   : > { %p440_p2 = pnand %p831_p13, %p830_p6 }
 0x12d   : > { %585 = dma.done.wait (!%p440_p2), %s337_s22, 64  }
 0x12e   : > { %587 = vsyncadd (!%p440_p2), %s337_s22, 4294967232  ;;  %s19_s17 = sadd.s32 1, %s610_s17   ;;  %s832_s12 = smov %s594_s13 }
 0x12f   : > { %p16_p5 = scmp.ge.s32.totalorder %s19_s17, 4   ;;  %s833_s13 = smov %s598_s14 }
 0x130   : > { %s834_s14 = smov %s694_s26  ;;  %s835_s15 = smov %s606_s16 }
 0x131   : > { %s836_s16 = smov %s838_s20  ;;  %18 = sbr.rel (!%p16_p5) target bundleno = 6 (0x6), region = 77 }
 0x138   :  { %342 = vsyncpa [#allocation3], 1 }
 0x139   :  { %344 = vsyncpa [#allocation3 + $0x1], 1 }
 0x13a   :  { %345 = vsyncpa [#allocation4], 1 }
 0x13b   :  { %347 = vsyncpa [#allocation4 + $0x1], 1 }

</bundles_post_ra>
